<compile_context>
chip_gen: v7x
topology: tpu7x:2x2x1
jax: 0.10.0
libtpu: 0.0.40
codegen_flags: <defaults>
</compile_context>

<pallas_src>
import functools

import numpy as np
import jax
import jax.numpy as jnp
from jax.experimental import pallas as pl
from jax.experimental.pallas import tpu as pltpu


# -----------------------------------------------------------------------------
# PixelCNN kernel_filter (mask) helper.
# TODO(synk): the repo's `kernel_filter` source was not provided; this is the
# standard Gated-PixelCNN vertical/horizontal mask (A/B via first_layer).
# -----------------------------------------------------------------------------
def kernel_filter_mask(kh, kw, horizontal, first_layer, blinded):
    m = np.ones((kh, kw), np.float32)
    if horizontal:
        m[:, kw // 2 + 1:] = 0.0
        if first_layer:
            m[:, kw // 2] = 0.0
    else:
        m[kh // 2 + 1:, :] = 0.0
        if blinded:
            m[kh // 2, :] = 0.0
        else:
            m[kh // 2, kw // 2 + 1:] = 0.0
            if first_layer:
                m[kh // 2, kw // 2] = 0.0
    return jnp.asarray(m)


# -----------------------------------------------------------------------------
# Deterministic parameter init (shapes follow the module's __init__).
# Conv weights: randn * 0.1 (masked), conv biases: zeros (bias_init()).
# -----------------------------------------------------------------------------
def init_params(key, in_c, out_c, kh, kw, emb_dim, first_layer=False, blinded=False):
    c2 = 2 * out_c
    ks = jax.random.split(key, 7)

    def w(k, shape):
        return jax.random.normal(k, shape, jnp.float32) * 0.1

    p = {}
    p["v_nxn_w"] = w(ks[0], (c2, in_c, kh, kw)) * kernel_filter_mask(kh, kw, False, first_layer, blinded)
    p["v_nxn_b"] = jnp.zeros((c2,), jnp.float32)
    p["v_1x1_w"] = w(ks[1], (c2, c2, 1, 1)) * kernel_filter_mask(1, 1, False, first_layer, blinded)
    p["v_1x1_b"] = jnp.zeros((c2,), jnp.float32)
    p["h_1xn_w"] = w(ks[2], (c2, in_c, 1, kw)) * kernel_filter_mask(1, kw, True, first_layer, blinded)
    p["h_1xn_b"] = jnp.zeros((c2,), jnp.float32)
    p["h_1x1_w"] = w(ks[3], (out_c, out_c, 1, 1)) * kernel_filter_mask(1, 1, True, first_layer, blinded)
    p["h_1x1_b"] = jnp.zeros((out_c,), jnp.float32)
    p["h_skip_w"] = w(ks[4], (out_c, out_c, 1, 1)) * kernel_filter_mask(1, 1, True, first_layer, blinded)
    p["h_skip_b"] = jnp.zeros((out_c,), jnp.float32)
    p["emb_w"] = w(ks[5], (c2, emb_dim))          # nn.Linear(emb_dim, 2*out_c) weight (out, in)
    p["emb_b"] = w(ks[6], (c2,))
    return p


# -----------------------------------------------------------------------------
# Row-band selection: TR rows per grid step, TR*W lanes per band.
# -----------------------------------------------------------------------------
def _pick_band_rows(H, W, in_c, out_c, act_bytes,
                    target_pixels=2048, vmem_budget=48 * 2**20):
    cands = [tr for tr in range(1, H + 1)
             if H % tr == 0 and (tr * W) % 128 == 0]
    if not cands:
        raise ValueError(
            f"no 128-lane-aligned row band exists for H={H}, W={W}; "
            "pad the image so (TR*W) % 128 == 0 for some divisor TR of H")

    def vmem_est(tr):
        # double-buffered activation blocks: v(2) + h + skip inputs, 3 outputs
        return 2 * (3 * in_c + 4 * out_c) * (tr * W) * act_bytes

    ok = [tr for tr in cands if vmem_est(tr) <= vmem_budget] or [min(cands)]

    def key(tr):
        mb = tr * W
        over = mb > target_pixels
        return (over,                           # prefer bands within the target range
                0 if mb % 256 == 0 else 1,      # prefer multiples of 256 (v6e/v7x MXU)
                mb if over else -mb)            # then the largest (or least-over)
    return min(ok, key=key)


# -----------------------------------------------------------------------------
# The Pallas kernel: one (batch, row-band) per grid step.
# All activations are channels-major (channels, TR*W pixels) -> lane-dense.
# Conv taps are built in VMEM by lane-shifting the flattened band and masking
# the columns that would fall into horizontal padding.
# -----------------------------------------------------------------------------
_ZPAD = 128  # lane-tile-aligned zero prefix so all tap slices have >= 0 offsets


def _gated_block_kernel(
    v0_ref, v1_ref, h_ref, skip_ref, hcol_ref,
    wv_ref, bv_ref, wv1_ref, wh_ref, whf_ref, bhf_ref,
    v_gated_ref, h_out_ref, skip_out_ref,
    *, out_channels, in_channels, kh, kw, W, band_pixels, residual,
):
    C = out_channels
    Cin = in_channels
    pw = kw // 2
    N = band_pixels
    f32 = jnp.float32

    # Streamed activations (possibly bf16) -> f32 for all in-kernel math.
    zlead = jnp.zeros((Cin, _ZPAD), f32)
    v_ext = jnp.concatenate(
        [zlead, v0_ref[0].astype(f32), v1_ref[0].astype(f32)], axis=-1)  # (Cin, _ZPAD+2N)
    h_band = h_ref[0].astype(f32)                                        # (Cin, N)
    h_ext = jnp.concatenate([zlead, h_band, zlead], axis=-1)             # (Cin, _ZPAD+N+_ZPAD)

    # Column index of every flattened pixel (horizontal edge masking).
    xcol = jax.lax.broadcasted_iota(jnp.int32, (Cin, N), 1) % W

    def tap(ext, dy, dx):
        # value needed at flat output pixel p is band[p + dy*W + dx - pw]
        start = _ZPAD - pw + dy * W + dx
        src = ext[:, start:start + N]
        rx = dx - pw
        if rx != 0:
            valid = (xcol + rx >= 0) & (xcol + rx < W)
            src = jnp.where(valid, src, 0.0)
        return src

    # ---- vertical n x n masked conv (mask baked into weights) -----------------
    v_conv = jnp.zeros((2 * C, N), f32)
    for dy in range(kh):
        for dx in range(kw):
            v_conv = v_conv + jnp.dot(wv_ref[dy * kw + dx], tap(v_ext, dy, dx),
                                      preferred_element_type=f32)
    v_conv = v_conv + bv_ref[...]

    # ---- horizontal 1 x n masked conv ------------------------------------------
    h_conv = jnp.zeros((2 * C, N), f32)
    for dx in range(kw):
        h_conv = h_conv + jnp.dot(wh_ref[dx], tap(h_ext, 0, dx),
                                  preferred_element_type=f32)

    # ---- vertical 1x1 link + folded (bh + bv1 + embedding) per-batch bias ------
    h_conv = h_conv + jnp.dot(wv1_ref[...], v_conv, preferred_element_type=f32)
    h_conv = h_conv + hcol_ref[0]

    # ---- gated units: tanh(f) * sigmoid(g) (channel chunks = sublane slices) ---
    h_gated = jnp.tanh(h_conv[:C]) * jax.nn.sigmoid(h_conv[C:])
    v_gated = jnp.tanh(v_conv[:C]) * jax.nn.sigmoid(v_conv[C:])

    # ---- fused h_skip / h_1x1 1x1 convs: rows [:C] skip delta, rows [C:] h_out -
    fused = jnp.dot(whf_ref[...], h_gated, preferred_element_type=f32) + bhf_ref[...]

    h_out = fused[C:]
    if residual:
        h_out = h_out + h_band[:C]           # requires Cin == C (asserted in wrapper)

    v_gated_ref[0] = v_gated.astype(v_gated_ref.dtype)
    h_out_ref[0] = h_out.astype(h_out_ref.dtype)
    skip_out_ref[0] = (skip_ref[0].astype(f32) + fused[:C]).astype(skip_out_ref.dtype)


# -----------------------------------------------------------------------------
# Wrapper: layout plumbing only (padding, flattening, weight re-layout,
# embedding projection).  Everything stays NCHW; no NHWC transposes.
# -----------------------------------------------------------------------------
def gated_cnn_block(params, v, h, skip, label, t, *, out_channels,
                    residual=True, first_layer=False,
                    act_dtype=jnp.bfloat16,
                    target_band_pixels=2048, vmem_budget_bytes=48 * 2**20):
    assert not first_layer, \
        "TODO(synk): first_layer=True (no skip/embedding) path not implemented"
    B, Cin, H, W = v.shape
    if h is None:
        h = v
    C = out_channels
    C2 = 2 * C
    kh, kw = params["v_nxn_w"].shape[2], params["v_nxn_w"].shape[3]
    ph, pw = kh // 2, kw // 2
    if skip is None:
        skip = jnp.zeros((B, C, H, W), v.dtype)
    use_residual = residual and not first_layer
    if use_residual:
        assert Cin == C, "residual branch requires in_channels == out_channels"
    # Sublane-aligned channel slices inside the kernel (perf review item).
    assert C % 8 == 0 and Cin % 8 == 0, "channels must be multiples of 8"

    act_bytes = np.dtype(act_dtype).itemsize
    TR = _pick_band_rows(H, W, Cin, C, act_bytes,
                         target_pixels=target_band_pixels,
                         vmem_budget=vmem_budget_bytes)
    assert TR >= max(kh, 2 * ph), "row band must cover the vertical halo"
    Mb = TR * W
    nb = H // TR          # grid is (B, nb); keep B*nb >= 2 so v7x's TCs both work
    P = H * W

    # ---- activation streams (optionally bf16) ----------------------------------
    v_act = v.astype(act_dtype)
    # Vertical zero padding: ph rows on top, TR - ph rows at the bottom, so band
    # r plus its halo is exactly blocks r and r+1 of the flattened padded image.
    v_flat = jnp.pad(v_act, ((0, 0), (0, 0), (ph, TR - ph), (0, 0))
                     ).reshape(B, Cin, (H + TR) * W)
    h_flat = h.astype(act_dtype).reshape(B, Cin, P)
    skip_flat = skip.astype(act_dtype).reshape(B, C, P)

    # ---- conditioning + bh + bv1 folded into one per-batch bias column ---------
    emb = jax.nn.gelu(label + t, approximate=False) @ params["emb_w"].T + params["emb_b"]
    hcol = (emb + params["h_1xn_b"] + params["v_1x1_b"]).astype(jnp.float32)[:, :, None]

    # ---- weight re-layout: one (2C, Cin) matrix per conv tap -------------------
    wv_taps = jnp.transpose(params["v_nxn_w"], (2, 3, 0, 1)).reshape(kh * kw, C2, Cin)
    wh_taps = jnp.transpose(params["h_1xn_w"][:, :, 0, :], (2, 0, 1))       # (kw, 2C, Cin)
    wv1 = params["v_1x1_w"][:, :, 0, 0]                                     # (2C, 2C)
    whf = jnp.concatenate([params["h_skip_w"][:, :, 0, 0],
                           params["h_1x1_w"][:, :, 0, 0]], axis=0)          # (2C, C)
    bv = params["v_nxn_b"][:, None]
    bhf = jnp.concatenate([params["h_skip_b"], params["h_1x1_b"]])[:, None]

    kern = functools.partial(
        _gated_block_kernel, out_channels=C, in_channels=Cin, kh=kh, kw=kw,
        W=W, band_pixels=Mb, residual=use_residual)

    band = lambda b, r: (b, 0, r)
    band_next = lambda b, r: (b, 0, r + 1)
    whole3 = lambda b, r: (0, 0, 0)
    whole2 = lambda b, r: (0, 0)

    flops = 2 * B * P * C2 * (Cin * kh * kw + C2 + Cin * kw + C)
    bytes_accessed = act_bytes * B * P * (3 * Cin + 4 * C) + 4 * (C2 * (Cin * (kh * kw + kw) + C2 + C + 3) + B * C2)
    cost = pl.CostEstimate(flops=int(flops), transcendentals=int(4 * B * P * C),
                           bytes_accessed=int(bytes_accessed))

    vmem_est = 2 * (3 * Cin + 4 * C) * Mb * act_bytes \
        + 8 * C2 * (Cin * (kh * kw + kw) + C2 + C + 3)
    vmem_limit = int(min(60 * 2**20, max(32 * 2**20, 4 * vmem_est)))

    vg, ho, so = pl.pallas_call(
        kern,
        out_shape=tuple(jax.ShapeDtypeStruct((B, C, P), act_dtype) for _ in range(3)),
        grid_spec=pltpu.PrefetchScalarGridSpec(
            num_scalar_prefetch=0,
            grid=(B, nb),
            in_specs=[
                pl.BlockSpec((1, Cin, Mb), band),                 # v band
                pl.BlockSpec((1, Cin, Mb), band_next),            # v band + vertical halo
                pl.BlockSpec((1, Cin, Mb), band),                 # h band
                pl.BlockSpec((1, C, Mb), band),                   # skip band (aliased out)
                pl.BlockSpec((1, C2, 1), lambda b, r: (b, 0, 0)),  # per-batch bias column
                pl.BlockSpec((kh * kw, C2, Cin), whole3),         # vertical conv taps
                pl.BlockSpec((C2, 1), whole2),                    # bv
                pl.BlockSpec((C2, C2), whole2),                   # v_1x1 weight
                pl.BlockSpec((kw, C2, Cin), whole3),              # horizontal conv taps
                pl.BlockSpec((C2, C), whole2),                    # fused h_skip/h_1x1 weight
                pl.BlockSpec((C2, 1), whole2),                    # fused bias
            ],
            out_specs=[
                pl.BlockSpec((1, C, Mb), band),
                pl.BlockSpec((1, C, Mb), band),
                pl.BlockSpec((1, C, Mb), band),
            ],
        ),
        input_output_aliases={3: 2},   # skip accumulates in place
        compiler_params=pltpu.CompilerParams(
            dimension_semantics=("parallel", "parallel"),
            vmem_limit_bytes=vmem_limit),
        cost_estimate=cost,
    )(v_flat, v_flat, h_flat, skip_flat, hcol,
      wv_taps, bv, wv1, wh_taps, whf, bhf)

    unflatten = lambda x: x.reshape(B, C, H, W)
    return unflatten(vg), unflatten(ho), unflatten(so), label, t


# -----------------------------------------------------------------------------
# Pure-JAX reference (mirrors the PyTorch forward, NCHW) for validation.
# -----------------------------------------------------------------------------
def ref_forward(params, v, h, skip, label, t, *, out_channels, residual=True):
    C = out_channels

    def conv(x, w, b):
        y = jax.lax.conv_general_dilated(
            x, w, window_strides=(1, 1), padding="SAME",
            dimension_numbers=("NCHW", "OIHW", "NCHW"))
        return y + b[None, :, None, None]

    v_conv = conv(v, params["v_nxn_w"], params["v_nxn_b"])
    v_link = conv(v_conv, params["v_1x1_w"], params["v_1x1_b"])
    h_conv = conv(h, params["h_1xn_w"], params["h_1xn_b"]) + v_link
    emb = jax.nn.gelu(label + t, approximate=False) @ params["emb_w"].T + params["emb_b"]
    h_conv = h_conv + emb[:, :, None, None]

    gate = lambda T: jnp.tanh(T[:, :C]) * jax.nn.sigmoid(T[:, C:])
    h_g = gate(h_conv)
    v_g = gate(v_conv)
    skip_out = skip + conv(h_g, params["h_skip_w"], params["h_skip_b"])
    h_out = conv(h_g, params["h_1x1_w"], params["h_1x1_b"])
    if residual:
        h_out = h_out + h
    return v_g, h_out, skip_out


if __name__ == "__main__":
    key = jax.random.PRNGKey(0)
    B, Cin, H, W = 2, 8, 16, 16
    Cout = 8          # == Cin so the residual branch is valid
    E = 32            # embedding_dim

    k_param, k_v, k_h, k_s, k_l, k_t = jax.random.split(key, 6)
    params = init_params(k_param, Cin, Cout, 3, 3, E, first_layer=False, blinded=False)

    v = jax.random.normal(k_v, (B, Cin, H, W), jnp.float32)
    h = jax.random.normal(k_h, (B, Cin, H, W), jnp.float32)
    skip = jax.random.normal(k_s, (B, Cout, H, W), jnp.float32)
    label = jax.random.normal(k_l, (B, E), jnp.float32)
    t = jax.random.normal(k_t, (B, E), jnp.float32)

    v_ref, h_ref_out, s_ref = ref_forward(params, v, h, skip, label, t,
                                          out_channels=Cout, residual=True)

    # float32 streaming: tight correctness check against the reference.
    fwd_f32 = jax.jit(functools.partial(gated_cnn_block, out_channels=Cout,
                                        residual=True, first_layer=False,
                                        act_dtype=jnp.float32))
    v_g, h_out, skip_out, _, _ = fwd_f32(params, v, h, skip, label, t)
    jax.block_until_ready((v_g, h_out, skip_out))
    np.testing.assert_allclose(np.asarray(v_g), np.asarray(v_ref), rtol=2e-4, atol=2e-4)
    np.testing.assert_allclose(np.asarray(h_out), np.asarray(h_ref_out), rtol=2e-4, atol=2e-4)
    np.testing.assert_allclose(np.asarray(skip_out), np.asarray(s_ref), rtol=2e-4, atol=2e-4)

    # bfloat16 streaming (halved HBM traffic): loose sanity check vs f32 reference.
    fwd_bf16 = jax.jit(functools.partial(gated_cnn_block, out_channels=Cout,
                                         residual=True, first_layer=False,
                                         act_dtype=jnp.bfloat16))
    v_gb, h_outb, skip_outb, _, _ = fwd_bf16(params, v, h, skip, label, t)
    jax.block_until_ready((v_gb, h_outb, skip_outb))
    np.testing.assert_allclose(np.asarray(v_gb.astype(jnp.float32)), np.asarray(v_ref),
                               rtol=1e-1, atol=1e-1)
    np.testing.assert_allclose(np.asarray(h_outb.astype(jnp.float32)), np.asarray(h_ref_out),
                               rtol=1e-1, atol=1e-1)
    np.testing.assert_allclose(np.asarray(skip_outb.astype(jnp.float32)), np.asarray(s_ref),
                               rtol=1e-1, atol=1e-1)

    print("KERNEL_OK")
</pallas_src>

<mosaic_0001>
module attributes {stable_mosaic.version = 11 : i64} {
  func.func @_gated_block_kernel(%arg0: i32, %arg1: i32, %arg2: memref<1x8x256xf32, #tpu.memory_space<vmem>>, %arg3: memref<1x8x256xf32, #tpu.memory_space<vmem>>, %arg4: memref<1x8x256xf32, #tpu.memory_space<vmem>>, %arg5: memref<1x8x256xf32, #tpu.memory_space<vmem>>, %arg6: memref<1x16x1xf32, #tpu.memory_space<vmem>>, %arg7: memref<9x16x8xf32, #tpu.memory_space<vmem>>, %arg8: memref<16x1xf32, #tpu.memory_space<vmem>>, %arg9: memref<16x16xf32, #tpu.memory_space<vmem>>, %arg10: memref<3x16x8xf32, #tpu.memory_space<vmem>>, %arg11: memref<16x8xf32, #tpu.memory_space<vmem>>, %arg12: memref<16x1xf32, #tpu.memory_space<vmem>>, %arg13: memref<1x8x256xf32, #tpu.memory_space<vmem>>, %arg14: memref<1x8x256xf32, #tpu.memory_space<vmem>>, %arg15: memref<1x8x256xf32, #tpu.memory_space<vmem>>) attributes {dimension_semantics = [#tpu.dimension_semantics<parallel>, #tpu.dimension_semantics<parallel>], iteration_bounds = array<i64: 2, 1>, scalar_prefetch = 0 : i64, scratch_operands = 0 : i64, tpu.core_type = #tpu.core_type<tc>, window_params = [{transform_indices = @transform_0, window_bounds = array<i64: 1, 8, 256>}, {transform_indices = @transform_1, window_bounds = array<i64: 1, 8, 256>}, {transform_indices = @transform_2, window_bounds = array<i64: 1, 8, 256>}, {transform_indices = @transform_3, window_bounds = array<i64: 1, 8, 256>}, {transform_indices = @transform_4, window_bounds = array<i64: 1, 16, 1>}, {pipeline_mode = #tpu.pipeline_mode<synchronous>, transform_indices = @transform_5, window_bounds = array<i64: 9, 16, 8>}, {pipeline_mode = #tpu.pipeline_mode<synchronous>, transform_indices = @transform_6, window_bounds = array<i64: 16, 1>}, {pipeline_mode = #tpu.pipeline_mode<synchronous>, transform_indices = @transform_7, window_bounds = array<i64: 16, 16>}, {pipeline_mode = #tpu.pipeline_mode<synchronous>, transform_indices = @transform_8, window_bounds = array<i64: 3, 16, 8>}, {pipeline_mode = #tpu.pipeline_mode<synchronous>, transform_indices = @transform_9, window_bounds = array<i64: 16, 8>}, {pipeline_mode = #tpu.pipeline_mode<synchronous>, transform_indices = @transform_10, window_bounds = array<i64: 16, 1>}, {transform_indices = @transform_11, window_bounds = array<i64: 1, 8, 256>}, {transform_indices = @transform_12, window_bounds = array<i64: 1, 8, 256>}, {transform_indices = @transform_13, window_bounds = array<i64: 1, 8, 256>}]} {
    %cst = arith.constant 0.000000e+00 : f32
    %0 = vector.broadcast %cst : f32 to vector<8x128xf32>
    %c0 = arith.constant 0 : index
    %c0_0 = arith.constant 0 : index
    %c0_1 = arith.constant 0 : index
    %1 = vector.load %arg2[%c0, %c0_0, %c0_1] : memref<1x8x256xf32, #tpu.memory_space<vmem>>, vector<1x8x256xf32>
    %2 = vector.shape_cast %1 : vector<1x8x256xf32> to vector<8x256xf32>
    %c0_2 = arith.constant 0 : index
    %c0_3 = arith.constant 0 : index
    %c0_4 = arith.constant 0 : index
    %3 = vector.load %arg3[%c0_2, %c0_3, %c0_4] : memref<1x8x256xf32, #tpu.memory_space<vmem>>, vector<1x8x256xf32>
    %4 = vector.shape_cast %3 : vector<1x8x256xf32> to vector<8x256xf32>
    %5 = tpu.concatenate %0, %2, %4 in 1 : vector<8x128xf32>, vector<8x256xf32>, vector<8x256xf32> -> vector<8x640xf32>
    %c0_5 = arith.constant 0 : index
    %c0_6 = arith.constant 0 : index
    %c0_7 = arith.constant 0 : index
    %6 = vector.load %arg4[%c0_5, %c0_6, %c0_7] : memref<1x8x256xf32, #tpu.memory_space<vmem>>, vector<1x8x256xf32>
    %7 = vector.shape_cast %6 : vector<1x8x256xf32> to vector<8x256xf32>
    %8 = tpu.concatenate %0, %7, %0 in 1 : vector<8x128xf32>, vector<8x256xf32>, vector<8x128xf32> -> vector<8x512xf32>
    %9 = tpu.iota {dimensions = array<i32: 1>} : vector<8x256xi32>
    %c16_i32 = arith.constant 16 : i32
    %c0_i32 = arith.constant 0 : i32
    %10 = arith.cmpi eq, %c16_i32, %c0_i32 : i32
    %c1_i32 = arith.constant 1 : i32
    %11 = arith.select %10, %c1_i32, %c16_i32 : i32
    %12 = vector.broadcast %11 : i32 to vector<8x256xi32>
    %13 = arith.remsi %9, %12 : vector<8x256xi32>
    %c0_i32_8 = arith.constant 0 : i32
    %14 = vector.broadcast %c0_i32_8 : i32 to vector<8x256xi32>
    %15 = arith.cmpi ne, %13, %14 : vector<8x256xi32>
    %c0_i32_9 = arith.constant 0 : i32
    %16 = vector.broadcast %c0_i32_9 : i32 to vector<8x256xi32>
    %17 = arith.cmpi slt, %13, %16 : vector<8x256xi32>
    %c0_i32_10 = arith.constant 0 : i32
    %18 = arith.cmpi slt, %11, %c0_i32_10 : i32
    %19 = vector.broadcast %18 : i1 to vector<8x256xi1>
    %20 = vector.broadcast %19 : vector<8x256xi1> to vector<8x256xi1>
    %21 = arith.xori %17, %20 : vector<8x256xi1>
    %22 = arith.andi %21, %15 : vector<8x256xi1>
    %23 = vector.broadcast %11 : i32 to vector<8x256xi32>
    %24 = arith.addi %13, %23 : vector<8x256xi32>
    %25 = arith.select %22, %24, %13 : vector<8x256xi1>, vector<8x256xi32>
    %cst_11 = arith.constant 0.000000e+00 : f32
    %26 = vector.broadcast %cst_11 : f32 to vector<16x256xf32>
    %c0_12 = arith.constant 0 : index
    %c0_13 = arith.constant 0 : index
    %c0_14 = arith.constant 0 : index
    %27 = vector.load %arg7[%c0_12, %c0_13, %c0_14] : memref<9x16x8xf32, #tpu.memory_space<vmem>>, vector<1x16x8xf32>
    %28 = vector.shape_cast %27 : vector<1x16x8xf32> to vector<16x8xf32>
    %29 = vector.extract_strided_slice %5 {offsets = [0, 127], sizes = [8, 256], strides = [1, 1]} : vector<8x640xf32> to vector<8x256xf32>
    %c-1_i32 = arith.constant -1 : i32
    %30 = vector.broadcast %c-1_i32 : i32 to vector<8x256xi32>
    %31 = arith.addi %25, %30 : vector<8x256xi32>
    %c0_i32_15 = arith.constant 0 : i32
    %32 = vector.broadcast %c0_i32_15 : i32 to vector<8x256xi32>
    %33 = arith.cmpi sge, %31, %32 : vector<8x256xi32>
    %c-1_i32_16 = arith.constant -1 : i32
    %34 = vector.broadcast %c-1_i32_16 : i32 to vector<8x256xi32>
    %35 = arith.addi %25, %34 : vector<8x256xi32>
    %c16_i32_17 = arith.constant 16 : i32
    %36 = vector.broadcast %c16_i32_17 : i32 to vector<8x256xi32>
    %37 = arith.cmpi slt, %35, %36 : vector<8x256xi32>
    %38 = arith.andi %33, %37 : vector<8x256xi1>
    %cst_18 = arith.constant 0.000000e+00 : f32
    %39 = vector.broadcast %cst_18 : f32 to vector<8x256xf32>
    %40 = arith.select %38, %29, %39 : vector<8x256xi1>, vector<8x256xf32>
    %cst_19 = arith.constant dense<0.000000e+00> : vector<16x256xf32>
    %41 = tpu.matmul %28, %40, %cst_19 {dimension_numbers = #tpu.dot_dimension_numbers<[1], [0], [0], [1], [0, 0, 1, 1], [], []>} : vector<16x8xf32>, vector<8x256xf32>, vector<16x256xf32> -> vector<16x256xf32>
    %42 = arith.addf %26, %41 : vector<16x256xf32>
    %c1 = arith.constant 1 : index
    %c0_20 = arith.constant 0 : index
    %c0_21 = arith.constant 0 : index
    %43 = vector.load %arg7[%c1, %c0_20, %c0_21] : memref<9x16x8xf32, #tpu.memory_space<vmem>>, vector<1x16x8xf32>
    %44 = vector.shape_cast %43 : vector<1x16x8xf32> to vector<16x8xf32>
    %45 = vector.extract_strided_slice %5 {offsets = [0, 128], sizes = [8, 256], strides = [1, 1]} : vector<8x640xf32> to vector<8x256xf32>
    %cst_22 = arith.constant dense<0.000000e+00> : vector<16x256xf32>
    %46 = tpu.matmul %44, %45, %cst_22 {dimension_numbers = #tpu.dot_dimension_numbers<[1], [0], [0], [1], [0, 0, 1, 1], [], []>} : vector<16x8xf32>, vector<8x256xf32>, vector<16x256xf32> -> vector<16x256xf32>
    %47 = arith.addf %42, %46 : vector<16x256xf32>
    %c2 = arith.constant 2 : index
    %c0_23 = arith.constant 0 : index
    %c0_24 = arith.constant 0 : index
    %48 = vector.load %arg7[%c2, %c0_23, %c0_24] : memref<9x16x8xf32, #tpu.memory_space<vmem>>, vector<1x16x8xf32>
    %49 = vector.shape_cast %48 : vector<1x16x8xf32> to vector<16x8xf32>
    %50 = vector.extract_strided_slice %5 {offsets = [0, 129], sizes = [8, 256], strides = [1, 1]} : vector<8x640xf32> to vector<8x256xf32>
    %c1_i32_25 = arith.constant 1 : i32
    %51 = vector.broadcast %c1_i32_25 : i32 to vector<8x256xi32>
    %52 = arith.addi %25, %51 : vector<8x256xi32>
    %c0_i32_26 = arith.constant 0 : i32
    %53 = vector.broadcast %c0_i32_26 : i32 to vector<8x256xi32>
    %54 = arith.cmpi sge, %52, %53 : vector<8x256xi32>
    %c1_i32_27 = arith.constant 1 : i32
    %55 = vector.broadcast %c1_i32_27 : i32 to vector<8x256xi32>
    %56 = arith.addi %25, %55 : vector<8x256xi32>
    %c16_i32_28 = arith.constant 16 : i32
    %57 = vector.broadcast %c16_i32_28 : i32 to vector<8x256xi32>
    %58 = arith.cmpi slt, %56, %57 : vector<8x256xi32>
    %59 = arith.andi %54, %58 : vector<8x256xi1>
    %cst_29 = arith.constant 0.000000e+00 : f32
    %60 = vector.broadcast %cst_29 : f32 to vector<8x256xf32>
    %61 = arith.select %59, %50, %60 : vector<8x256xi1>, vector<8x256xf32>
    %cst_30 = arith.constant dense<0.000000e+00> : vector<16x256xf32>
    %62 = tpu.matmul %49, %61, %cst_30 {dimension_numbers = #tpu.dot_dimension_numbers<[1], [0], [0], [1], [0, 0, 1, 1], [], []>} : vector<16x8xf32>, vector<8x256xf32>, vector<16x256xf32> -> vector<16x256xf32>
    %63 = arith.addf %47, %62 : vector<16x256xf32>
    %c3 = arith.constant 3 : index
    %c0_31 = arith.constant 0 : index
    %c0_32 = arith.constant 0 : index
    %64 = vector.load %arg7[%c3, %c0_31, %c0_32] : memref<9x16x8xf32, #tpu.memory_space<vmem>>, vector<1x16x8xf32>
    %65 = vector.shape_cast %64 : vector<1x16x8xf32> to vector<16x8xf32>
    %66 = vector.extract_strided_slice %5 {offsets = [0, 143], sizes = [8, 256], strides = [1, 1]} : vector<8x640xf32> to vector<8x256xf32>
    %c-1_i32_33 = arith.constant -1 : i32
    %67 = vector.broadcast %c-1_i32_33 : i32 to vector<8x256xi32>
    %68 = arith.addi %25, %67 : vector<8x256xi32>
    %c0_i32_34 = arith.constant 0 : i32
    %69 = vector.broadcast %c0_i32_34 : i32 to vector<8x256xi32>
    %70 = arith.cmpi sge, %68, %69 : vector<8x256xi32>
    %c-1_i32_35 = arith.constant -1 : i32
    %71 = vector.broadcast %c-1_i32_35 : i32 to vector<8x256xi32>
    %72 = arith.addi %25, %71 : vector<8x256xi32>
    %c16_i32_36 = arith.constant 16 : i32
    %73 = vector.broadcast %c16_i32_36 : i32 to vector<8x256xi32>
    %74 = arith.cmpi slt, %72, %73 : vector<8x256xi32>
    %75 = arith.andi %70, %74 : vector<8x256xi1>
    %cst_37 = arith.constant 0.000000e+00 : f32
    %76 = vector.broadcast %cst_37 : f32 to vector<8x256xf32>
    %77 = arith.select %75, %66, %76 : vector<8x256xi1>, vector<8x256xf32>
    %cst_38 = arith.constant dense<0.000000e+00> : vector<16x256xf32>
    %78 = tpu.matmul %65, %77, %cst_38 {dimension_numbers = #tpu.dot_dimension_numbers<[1], [0], [0], [1], [0, 0, 1, 1], [], []>} : vector<16x8xf32>, vector<8x256xf32>, vector<16x256xf32> -> vector<16x256xf32>
    %79 = arith.addf %63, %78 : vector<16x256xf32>
    %c4 = arith.constant 4 : index
    %c0_39 = arith.constant 0 : index
    %c0_40 = arith.constant 0 : index
    %80 = vector.load %arg7[%c4, %c0_39, %c0_40] : memref<9x16x8xf32, #tpu.memory_space<vmem>>, vector<1x16x8xf32>
    %81 = vector.shape_cast %80 : vector<1x16x8xf32> to vector<16x8xf32>
    %82 = vector.extract_strided_slice %5 {offsets = [0, 144], sizes = [8, 256], strides = [1, 1]} : vector<8x640xf32> to vector<8x256xf32>
    %cst_41 = arith.constant dense<0.000000e+00> : vector<16x256xf32>
    %83 = tpu.matmul %81, %82, %cst_41 {dimension_numbers = #tpu.dot_dimension_numbers<[1], [0], [0], [1], [0, 0, 1, 1], [], []>} : vector<16x8xf32>, vector<8x256xf32>, vector<16x256xf32> -> vector<16x256xf32>
    %84 = arith.addf %79, %83 : vector<16x256xf32>
    %c5 = arith.constant 5 : index
    %c0_42 = arith.constant 0 : index
    %c0_43 = arith.constant 0 : index
    %85 = vector.load %arg7[%c5, %c0_42, %c0_43] : memref<9x16x8xf32, #tpu.memory_space<vmem>>, vector<1x16x8xf32>
    %86 = vector.shape_cast %85 : vector<1x16x8xf32> to vector<16x8xf32>
    %87 = vector.extract_strided_slice %5 {offsets = [0, 145], sizes = [8, 256], strides = [1, 1]} : vector<8x640xf32> to vector<8x256xf32>
    %c1_i32_44 = arith.constant 1 : i32
    %88 = vector.broadcast %c1_i32_44 : i32 to vector<8x256xi32>
    %89 = arith.addi %25, %88 : vector<8x256xi32>
    %c0_i32_45 = arith.constant 0 : i32
    %90 = vector.broadcast %c0_i32_45 : i32 to vector<8x256xi32>
    %91 = arith.cmpi sge, %89, %90 : vector<8x256xi32>
    %c1_i32_46 = arith.constant 1 : i32
    %92 = vector.broadcast %c1_i32_46 : i32 to vector<8x256xi32>
    %93 = arith.addi %25, %92 : vector<8x256xi32>
    %c16_i32_47 = arith.constant 16 : i32
    %94 = vector.broadcast %c16_i32_47 : i32 to vector<8x256xi32>
    %95 = arith.cmpi slt, %93, %94 : vector<8x256xi32>
    %96 = arith.andi %91, %95 : vector<8x256xi1>
    %cst_48 = arith.constant 0.000000e+00 : f32
    %97 = vector.broadcast %cst_48 : f32 to vector<8x256xf32>
    %98 = arith.select %96, %87, %97 : vector<8x256xi1>, vector<8x256xf32>
    %cst_49 = arith.constant dense<0.000000e+00> : vector<16x256xf32>
    %99 = tpu.matmul %86, %98, %cst_49 {dimension_numbers = #tpu.dot_dimension_numbers<[1], [0], [0], [1], [0, 0, 1, 1], [], []>} : vector<16x8xf32>, vector<8x256xf32>, vector<16x256xf32> -> vector<16x256xf32>
    %100 = arith.addf %84, %99 : vector<16x256xf32>
    %c6 = arith.constant 6 : index
    %c0_50 = arith.constant 0 : index
    %c0_51 = arith.constant 0 : index
    %101 = vector.load %arg7[%c6, %c0_50, %c0_51] : memref<9x16x8xf32, #tpu.memory_space<vmem>>, vector<1x16x8xf32>
    %102 = vector.shape_cast %101 : vector<1x16x8xf32> to vector<16x8xf32>
    %103 = vector.extract_strided_slice %5 {offsets = [0, 159], sizes = [8, 256], strides = [1, 1]} : vector<8x640xf32> to vector<8x256xf32>
    %c-1_i32_52 = arith.constant -1 : i32
    %104 = vector.broadcast %c-1_i32_52 : i32 to vector<8x256xi32>
    %105 = arith.addi %25, %104 : vector<8x256xi32>
    %c0_i32_53 = arith.constant 0 : i32
    %106 = vector.broadcast %c0_i32_53 : i32 to vector<8x256xi32>
    %107 = arith.cmpi sge, %105, %106 : vector<8x256xi32>
    %c-1_i32_54 = arith.constant -1 : i32
    %108 = vector.broadcast %c-1_i32_54 : i32 to vector<8x256xi32>
    %109 = arith.addi %25, %108 : vector<8x256xi32>
    %c16_i32_55 = arith.constant 16 : i32
    %110 = vector.broadcast %c16_i32_55 : i32 to vector<8x256xi32>
    %111 = arith.cmpi slt, %109, %110 : vector<8x256xi32>
    %112 = arith.andi %107, %111 : vector<8x256xi1>
    %cst_56 = arith.constant 0.000000e+00 : f32
    %113 = vector.broadcast %cst_56 : f32 to vector<8x256xf32>
    %114 = arith.select %112, %103, %113 : vector<8x256xi1>, vector<8x256xf32>
    %cst_57 = arith.constant dense<0.000000e+00> : vector<16x256xf32>
    %115 = tpu.matmul %102, %114, %cst_57 {dimension_numbers = #tpu.dot_dimension_numbers<[1], [0], [0], [1], [0, 0, 1, 1], [], []>} : vector<16x8xf32>, vector<8x256xf32>, vector<16x256xf32> -> vector<16x256xf32>
    %116 = arith.addf %100, %115 : vector<16x256xf32>
    %c7 = arith.constant 7 : index
    %c0_58 = arith.constant 0 : index
    %c0_59 = arith.constant 0 : index
    %117 = vector.load %arg7[%c7, %c0_58, %c0_59] : memref<9x16x8xf32, #tpu.memory_space<vmem>>, vector<1x16x8xf32>
    %118 = vector.shape_cast %117 : vector<1x16x8xf32> to vector<16x8xf32>
    %119 = vector.extract_strided_slice %5 {offsets = [0, 160], sizes = [8, 256], strides = [1, 1]} : vector<8x640xf32> to vector<8x256xf32>
    %cst_60 = arith.constant dense<0.000000e+00> : vector<16x256xf32>
    %120 = tpu.matmul %118, %119, %cst_60 {dimension_numbers = #tpu.dot_dimension_numbers<[1], [0], [0], [1], [0, 0, 1, 1], [], []>} : vector<16x8xf32>, vector<8x256xf32>, vector<16x256xf32> -> vector<16x256xf32>
    %121 = arith.addf %116, %120 : vector<16x256xf32>
    %c8 = arith.constant 8 : index
    %c0_61 = arith.constant 0 : index
    %c0_62 = arith.constant 0 : index
    %122 = vector.load %arg7[%c8, %c0_61, %c0_62] : memref<9x16x8xf32, #tpu.memory_space<vmem>>, vector<1x16x8xf32>
    %123 = vector.shape_cast %122 : vector<1x16x8xf32> to vector<16x8xf32>
    %124 = vector.extract_strided_slice %5 {offsets = [0, 161], sizes = [8, 256], strides = [1, 1]} : vector<8x640xf32> to vector<8x256xf32>
    %c1_i32_63 = arith.constant 1 : i32
    %125 = vector.broadcast %c1_i32_63 : i32 to vector<8x256xi32>
    %126 = arith.addi %25, %125 : vector<8x256xi32>
    %c0_i32_64 = arith.constant 0 : i32
    %127 = vector.broadcast %c0_i32_64 : i32 to vector<8x256xi32>
    %128 = arith.cmpi sge, %126, %127 : vector<8x256xi32>
    %c1_i32_65 = arith.constant 1 : i32
    %129 = vector.broadcast %c1_i32_65 : i32 to vector<8x256xi32>
    %130 = arith.addi %25, %129 : vector<8x256xi32>
    %c16_i32_66 = arith.constant 16 : i32
    %131 = vector.broadcast %c16_i32_66 : i32 to vector<8x256xi32>
    %132 = arith.cmpi slt, %130, %131 : vector<8x256xi32>
    %133 = arith.andi %128, %132 : vector<8x256xi1>
    %cst_67 = arith.constant 0.000000e+00 : f32
    %134 = vector.broadcast %cst_67 : f32 to vector<8x256xf32>
    %135 = arith.select %133, %124, %134 : vector<8x256xi1>, vector<8x256xf32>
    %cst_68 = arith.constant dense<0.000000e+00> : vector<16x256xf32>
    %136 = tpu.matmul %123, %135, %cst_68 {dimension_numbers = #tpu.dot_dimension_numbers<[1], [0], [0], [1], [0, 0, 1, 1], [], []>} : vector<16x8xf32>, vector<8x256xf32>, vector<16x256xf32> -> vector<16x256xf32>
    %137 = arith.addf %121, %136 : vector<16x256xf32>
    %c0_69 = arith.constant 0 : index
    %c0_70 = arith.constant 0 : index
    %138 = vector.load %arg8[%c0_69, %c0_70] : memref<16x1xf32, #tpu.memory_space<vmem>>, vector<16x1xf32>
    %139 = vector.broadcast %138 : vector<16x1xf32> to vector<16x256xf32>
    %140 = arith.addf %137, %139 : vector<16x256xf32>
    %cst_71 = arith.constant 0.000000e+00 : f32
    %141 = vector.broadcast %cst_71 : f32 to vector<16x256xf32>
    %c0_72 = arith.constant 0 : index
    %c0_73 = arith.constant 0 : index
    %c0_74 = arith.constant 0 : index
    %142 = vector.load %arg10[%c0_72, %c0_73, %c0_74] : memref<3x16x8xf32, #tpu.memory_space<vmem>>, vector<1x16x8xf32>
    %143 = vector.shape_cast %142 : vector<1x16x8xf32> to vector<16x8xf32>
    %144 = vector.extract_strided_slice %8 {offsets = [0, 127], sizes = [8, 256], strides = [1, 1]} : vector<8x512xf32> to vector<8x256xf32>
    %c-1_i32_75 = arith.constant -1 : i32
    %145 = vector.broadcast %c-1_i32_75 : i32 to vector<8x256xi32>
    %146 = arith.addi %25, %145 : vector<8x256xi32>
    %c0_i32_76 = arith.constant 0 : i32
    %147 = vector.broadcast %c0_i32_76 : i32 to vector<8x256xi32>
    %148 = arith.cmpi sge, %146, %147 : vector<8x256xi32>
    %c-1_i32_77 = arith.constant -1 : i32
    %149 = vector.broadcast %c-1_i32_77 : i32 to vector<8x256xi32>
    %150 = arith.addi %25, %149 : vector<8x256xi32>
    %c16_i32_78 = arith.constant 16 : i32
    %151 = vector.broadcast %c16_i32_78 : i32 to vector<8x256xi32>
    %152 = arith.cmpi slt, %150, %151 : vector<8x256xi32>
    %153 = arith.andi %148, %152 : vector<8x256xi1>
    %cst_79 = arith.constant 0.000000e+00 : f32
    %154 = vector.broadcast %cst_79 : f32 to vector<8x256xf32>
    %155 = arith.select %153, %144, %154 : vector<8x256xi1>, vector<8x256xf32>
    %cst_80 = arith.constant dense<0.000000e+00> : vector<16x256xf32>
    %156 = tpu.matmul %143, %155, %cst_80 {dimension_numbers = #tpu.dot_dimension_numbers<[1], [0], [0], [1], [0, 0, 1, 1], [], []>} : vector<16x8xf32>, vector<8x256xf32>, vector<16x256xf32> -> vector<16x256xf32>
    %157 = arith.addf %141, %156 : vector<16x256xf32>
    %c1_81 = arith.constant 1 : index
    %c0_82 = arith.constant 0 : index
    %c0_83 = arith.constant 0 : index
    %158 = vector.load %arg10[%c1_81, %c0_82, %c0_83] : memref<3x16x8xf32, #tpu.memory_space<vmem>>, vector<1x16x8xf32>
    %159 = vector.shape_cast %158 : vector<1x16x8xf32> to vector<16x8xf32>
    %160 = vector.extract_strided_slice %8 {offsets = [0, 128], sizes = [8, 256], strides = [1, 1]} : vector<8x512xf32> to vector<8x256xf32>
    %cst_84 = arith.constant dense<0.000000e+00> : vector<16x256xf32>
    %161 = tpu.matmul %159, %160, %cst_84 {dimension_numbers = #tpu.dot_dimension_numbers<[1], [0], [0], [1], [0, 0, 1, 1], [], []>} : vector<16x8xf32>, vector<8x256xf32>, vector<16x256xf32> -> vector<16x256xf32>
    %162 = arith.addf %157, %161 : vector<16x256xf32>
    %c2_85 = arith.constant 2 : index
    %c0_86 = arith.constant 0 : index
    %c0_87 = arith.constant 0 : index
    %163 = vector.load %arg10[%c2_85, %c0_86, %c0_87] : memref<3x16x8xf32, #tpu.memory_space<vmem>>, vector<1x16x8xf32>
    %164 = vector.shape_cast %163 : vector<1x16x8xf32> to vector<16x8xf32>
    %165 = vector.extract_strided_slice %8 {offsets = [0, 129], sizes = [8, 256], strides = [1, 1]} : vector<8x512xf32> to vector<8x256xf32>
    %c1_i32_88 = arith.constant 1 : i32
    %166 = vector.broadcast %c1_i32_88 : i32 to vector<8x256xi32>
    %167 = arith.addi %25, %166 : vector<8x256xi32>
    %c0_i32_89 = arith.constant 0 : i32
    %168 = vector.broadcast %c0_i32_89 : i32 to vector<8x256xi32>
    %169 = arith.cmpi sge, %167, %168 : vector<8x256xi32>
    %c1_i32_90 = arith.constant 1 : i32
    %170 = vector.broadcast %c1_i32_90 : i32 to vector<8x256xi32>
    %171 = arith.addi %25, %170 : vector<8x256xi32>
    %c16_i32_91 = arith.constant 16 : i32
    %172 = vector.broadcast %c16_i32_91 : i32 to vector<8x256xi32>
    %173 = arith.cmpi slt, %171, %172 : vector<8x256xi32>
    %174 = arith.andi %169, %173 : vector<8x256xi1>
    %cst_92 = arith.constant 0.000000e+00 : f32
    %175 = vector.broadcast %cst_92 : f32 to vector<8x256xf32>
    %176 = arith.select %174, %165, %175 : vector<8x256xi1>, vector<8x256xf32>
    %cst_93 = arith.constant dense<0.000000e+00> : vector<16x256xf32>
    %177 = tpu.matmul %164, %176, %cst_93 {dimension_numbers = #tpu.dot_dimension_numbers<[1], [0], [0], [1], [0, 0, 1, 1], [], []>} : vector<16x8xf32>, vector<8x256xf32>, vector<16x256xf32> -> vector<16x256xf32>
    %178 = arith.addf %162, %177 : vector<16x256xf32>
    %c0_94 = arith.constant 0 : index
    %c0_95 = arith.constant 0 : index
    %179 = vector.load %arg9[%c0_94, %c0_95] : memref<16x16xf32, #tpu.memory_space<vmem>>, vector<16x16xf32>
    %cst_96 = arith.constant dense<0.000000e+00> : vector<16x256xf32>
    %180 = tpu.matmul %179, %140, %cst_96 {dimension_numbers = #tpu.dot_dimension_numbers<[1], [0], [0], [1], [0, 0, 1, 1], [], []>} : vector<16x16xf32>, vector<16x256xf32>, vector<16x256xf32> -> vector<16x256xf32>
    %181 = arith.addf %178, %180 : vector<16x256xf32>
    %c0_97 = arith.constant 0 : index
    %c0_98 = arith.constant 0 : index
    %c0_99 = arith.constant 0 : index
    %182 = vector.load %arg6[%c0_97, %c0_98, %c0_99] : memref<1x16x1xf32, #tpu.memory_space<vmem>>, vector<1x16x1xf32>
    %183 = vector.shape_cast %182 : vector<1x16x1xf32> to vector<16x1xf32>
    %184 = vector.broadcast %183 : vector<16x1xf32> to vector<16x256xf32>
    %185 = arith.addf %181, %184 : vector<16x256xf32>
    %186 = vector.extract_strided_slice %185 {offsets = [0, 0], sizes = [8, 256], strides = [1, 1]} : vector<16x256xf32> to vector<8x256xf32>
    %187 = math.tanh %186 : vector<8x256xf32>
    %188 = vector.extract_strided_slice %185 {offsets = [8, 0], sizes = [8, 256], strides = [1, 1]} : vector<16x256xf32> to vector<8x256xf32>
    %189 = arith.negf %188 : vector<8x256xf32>
    %190 = math.exp %189 : vector<8x256xf32>
    %cst_100 = arith.constant 1.000000e+00 : f32
    %191 = vector.broadcast %cst_100 : f32 to vector<8x256xf32>
    %192 = arith.addf %191, %190 : vector<8x256xf32>
    %193 = arith.divf %191, %192 : vector<8x256xf32>
    %194 = arith.mulf %187, %193 : vector<8x256xf32>
    %195 = vector.extract_strided_slice %140 {offsets = [0, 0], sizes = [8, 256], strides = [1, 1]} : vector<16x256xf32> to vector<8x256xf32>
    %196 = math.tanh %195 : vector<8x256xf32>
    %197 = vector.extract_strided_slice %140 {offsets = [8, 0], sizes = [8, 256], strides = [1, 1]} : vector<16x256xf32> to vector<8x256xf32>
    %198 = arith.negf %197 : vector<8x256xf32>
    %199 = math.exp %198 : vector<8x256xf32>
    %cst_101 = arith.constant 1.000000e+00 : f32
    %200 = vector.broadcast %cst_101 : f32 to vector<8x256xf32>
    %201 = arith.addf %200, %199 : vector<8x256xf32>
    %202 = arith.divf %200, %201 : vector<8x256xf32>
    %203 = arith.mulf %196, %202 : vector<8x256xf32>
    %c0_102 = arith.constant 0 : index
    %c0_103 = arith.constant 0 : index
    %204 = vector.load %arg11[%c0_102, %c0_103] : memref<16x8xf32, #tpu.memory_space<vmem>>, vector<16x8xf32>
    %cst_104 = arith.constant dense<0.000000e+00> : vector<16x256xf32>
    %205 = tpu.matmul %204, %194, %cst_104 {dimension_numbers = #tpu.dot_dimension_numbers<[1], [0], [0], [1], [0, 0, 1, 1], [], []>} : vector<16x8xf32>, vector<8x256xf32>, vector<16x256xf32> -> vector<16x256xf32>
    %c0_105 = arith.constant 0 : index
    %c0_106 = arith.constant 0 : index
    %206 = vector.load %arg12[%c0_105, %c0_106] : memref<16x1xf32, #tpu.memory_space<vmem>>, vector<16x1xf32>
    %207 = vector.broadcast %206 : vector<16x1xf32> to vector<16x256xf32>
    %208 = arith.addf %205, %207 : vector<16x256xf32>
    %209 = vector.extract_strided_slice %208 {offsets = [8, 0], sizes = [8, 256], strides = [1, 1]} : vector<16x256xf32> to vector<8x256xf32>
    %210 = arith.addf %209, %7 : vector<8x256xf32>
    %c0_107 = arith.constant 0 : index
    %c0_108 = arith.constant 0 : index
    %c0_109 = arith.constant 0 : index
    %211 = vector.load %arg13[%c0_107, %c0_108, %c0_109] : memref<1x8x256xf32, #tpu.memory_space<vmem>>, vector<1x8x256xf32>
    %212 = vector.shape_cast %211 : vector<1x8x256xf32> to vector<8x256xf32>
    %213 = vector.shape_cast %203 : vector<8x256xf32> to vector<1x8x256xf32>
    tpu.vector_store %arg13[%c0_107, %c0_108, %c0_109], %213 {strides = array<i32>} : memref<1x8x256xf32, #tpu.memory_space<vmem>>, vector<1x8x256xf32>,
    %c0_110 = arith.constant 0 : index
    %c0_111 = arith.constant 0 : index
    %c0_112 = arith.constant 0 : index
    %214 = vector.load %arg14[%c0_110, %c0_111, %c0_112] : memref<1x8x256xf32, #tpu.memory_space<vmem>>, vector<1x8x256xf32>
    %215 = vector.shape_cast %214 : vector<1x8x256xf32> to vector<8x256xf32>
    %216 = vector.shape_cast %210 : vector<8x256xf32> to vector<1x8x256xf32>
    tpu.vector_store %arg14[%c0_110, %c0_111, %c0_112], %216 {strides = array<i32>} : memref<1x8x256xf32, #tpu.memory_space<vmem>>, vector<1x8x256xf32>,
    %c0_113 = arith.constant 0 : index
    %c0_114 = arith.constant 0 : index
    %c0_115 = arith.constant 0 : index
    %217 = vector.load %arg5[%c0_113, %c0_114, %c0_115] : memref<1x8x256xf32, #tpu.memory_space<vmem>>, vector<1x8x256xf32>
    %218 = vector.shape_cast %217 : vector<1x8x256xf32> to vector<8x256xf32>
    %219 = vector.extract_strided_slice %208 {offsets = [0, 0], sizes = [8, 256], strides = [1, 1]} : vector<16x256xf32> to vector<8x256xf32>
    %220 = arith.addf %218, %219 : vector<8x256xf32>
    %c0_116 = arith.constant 0 : index
    %c0_117 = arith.constant 0 : index
    %c0_118 = arith.constant 0 : index
    %221 = vector.load %arg15[%c0_116, %c0_117, %c0_118] : memref<1x8x256xf32, #tpu.memory_space<vmem>>, vector<1x8x256xf32>
    %222 = vector.shape_cast %221 : vector<1x8x256xf32> to vector<8x256xf32>
    %223 = vector.shape_cast %220 : vector<8x256xf32> to vector<1x8x256xf32>
    tpu.vector_store %arg15[%c0_116, %c0_117, %c0_118], %223 {strides = array<i32>} : memref<1x8x256xf32, #tpu.memory_space<vmem>>, vector<1x8x256xf32>,
    return
  }
  func.func @transform_0(%arg0: i32, %arg1: i32) -> (i32, i32, i32) {
    %c0_i32 = arith.constant 0 : i32
    %c0_i32_0 = arith.constant 0 : i32
    return %arg0, %c0_i32, %arg1 : i32, i32, i32
  }
  func.func @transform_1(%arg0: i32, %arg1: i32) -> (i32, i32, i32) {
    %c1_i32 = arith.constant 1 : i32
    %0 = arith.addi %arg1, %c1_i32 : i32
    %c0_i32 = arith.constant 0 : i32
    %c0_i32_0 = arith.constant 0 : i32
    return %arg0, %c0_i32, %0 : i32, i32, i32
  }
  func.func @transform_2(%arg0: i32, %arg1: i32) -> (i32, i32, i32) {
    %c0_i32 = arith.constant 0 : i32
    %c0_i32_0 = arith.constant 0 : i32
    return %arg0, %c0_i32, %arg1 : i32, i32, i32
  }
  func.func @transform_3(%arg0: i32, %arg1: i32) -> (i32, i32, i32) {
    %c0_i32 = arith.constant 0 : i32
    %c0_i32_0 = arith.constant 0 : i32
    return %arg0, %c0_i32, %arg1 : i32, i32, i32
  }
  func.func @transform_4(%arg0: i32, %arg1: i32) -> (i32, i32, i32) {
    %c0_i32 = arith.constant 0 : i32
    %c0_i32_0 = arith.constant 0 : i32
    %c0_i32_1 = arith.constant 0 : i32
    return %arg0, %c0_i32, %c0_i32_0 : i32, i32, i32
  }
  func.func @transform_5(%arg0: i32, %arg1: i32) -> (i32, i32, i32) {
    %c0_i32 = arith.constant 0 : i32
    %c0_i32_0 = arith.constant 0 : i32
    %c0_i32_1 = arith.constant 0 : i32
    %c0_i32_2 = arith.constant 0 : i32
    return %c0_i32, %c0_i32_0, %c0_i32_1 : i32, i32, i32
  }
  func.func @transform_6(%arg0: i32, %arg1: i32) -> (i32, i32) {
    %c0_i32 = arith.constant 0 : i32
    %c0_i32_0 = arith.constant 0 : i32
    %c0_i32_1 = arith.constant 0 : i32
    return %c0_i32, %c0_i32_0 : i32, i32
  }
  func.func @transform_7(%arg0: i32, %arg1: i32) -> (i32, i32) {
    %c0_i32 = arith.constant 0 : i32
    %c0_i32_0 = arith.constant 0 : i32
    %c0_i32_1 = arith.constant 0 : i32
    return %c0_i32, %c0_i32_0 : i32, i32
  }
  func.func @transform_8(%arg0: i32, %arg1: i32) -> (i32, i32, i32) {
    %c0_i32 = arith.constant 0 : i32
    %c0_i32_0 = arith.constant 0 : i32
    %c0_i32_1 = arith.constant 0 : i32
    %c0_i32_2 = arith.constant 0 : i32
    return %c0_i32, %c0_i32_0, %c0_i32_1 : i32, i32, i32
  }
  func.func @transform_9(%arg0: i32, %arg1: i32) -> (i32, i32) {
    %c0_i32 = arith.constant 0 : i32
    %c0_i32_0 = arith.constant 0 : i32
    %c0_i32_1 = arith.constant 0 : i32
    return %c0_i32, %c0_i32_0 : i32, i32
  }
  func.func @transform_10(%arg0: i32, %arg1: i32) -> (i32, i32) {
    %c0_i32 = arith.constant 0 : i32
    %c0_i32_0 = arith.constant 0 : i32
    %c0_i32_1 = arith.constant 0 : i32
    return %c0_i32, %c0_i32_0 : i32, i32
  }
  func.func @transform_11(%arg0: i32, %arg1: i32) -> (i32, i32, i32) {
    %c0_i32 = arith.constant 0 : i32
    %c0_i32_0 = arith.constant 0 : i32
    return %arg0, %c0_i32, %arg1 : i32, i32, i32
  }
  func.func @transform_12(%arg0: i32, %arg1: i32) -> (i32, i32, i32) {
    %c0_i32 = arith.constant 0 : i32
    %c0_i32_0 = arith.constant 0 : i32
    return %arg0, %c0_i32, %arg1 : i32, i32, i32
  }
  func.func @transform_13(%arg0: i32, %arg1: i32) -> (i32, i32, i32) {
    %c0_i32 = arith.constant 0 : i32
    %c0_i32_0 = arith.constant 0 : i32
    return %arg0, %c0_i32, %arg1 : i32, i32, i32
  }
}

</mosaic_0001>

<bundles_post_ra>
// kernel: gated_cnn_block.1
= control target key start
LH: loop header
LB: loop body
LE: loop exit
PB: predicated region body
PF: predicated region fallthrough
CT: control target
= control target key end

     0   :  { %s2730_s25 = smov 0   ;;  %s2732_s26 = smov 0   ;;  %s3019_s0 = inlined_call_operand.vmem [shape: f32[2,8,512], index: 0, kind: input, shape index: {}, may-alias: {0,1}]   ;;  %s3020_s1 = inlined_call_operand.vmem [shape: f32[2,8,512], index: 1, kind: input, shape index: {}, may-alias: {0,1}]   ;;  %s3021_s2 = inlined_call_operand.vmem [shape: f32[2,8,256], index: 2, kind: input, shape index: {}]   ;;  %s3022_s3 = inlined_call_operand.vmem [shape: f32[2,8,256], index: 3, kind: input, shape index: {}, may-alias: {3,13}]   ;;  %s3023_s4 = inlined_call_operand.vmem [shape: f32[2,16,1], index: 4, kind: input, shape index: {}]   ;;  %s3024_s5 = inlined_call_operand.vmem [shape: f32[9,16,8], index: 5, kind: input, shape index: {}]   ;;  %s3025_s6 = inlined_call_operand.vmem [shape: f32[16,1], index: 6, kind: input, shape index: {}]   ;;  %s3026_s7 = inlined_call_operand.vmem [shape: f32[16,16], index: 7, kind: input, shape index: {}]   ;;  %s3027_s8 = inlined_call_operand.vmem [shape: f32[3,16,8], index: 8, kind: input, shape index: {}]   ;;  %s3028_s9 = inlined_call_operand.vmem [shape: f32[16,8], index: 9, kind: input, shape index: {}]   ;;  %s3029_s10 = inlined_call_operand.vmem [shape: f32[16,1], index: 10, kind: input, shape index: {}]   ;;  %s3030_s11 = inlined_call_operand.vmem [shape: f32[2,8,256], index: 11, kind: output, shape index: {0}]   ;;  %s3031_s12 = inlined_call_operand.vmem [shape: f32[2,8,256], index: 12, kind: output, shape index: {1}]   ;;  %s3032_s13 = inlined_call_operand.vmem [shape: f32[2,8,256], index: 13, kind: output, shape index: {2}, may-alias: {3,13}]  }
   0x1   :  { %s2734_s27 = smov 0  }
   0x2 LB: > { %s36_s28 = sadd.s32 1, %s2644_s26  ;;  %p2421_p0 = scmp.ge.s32.totalorder %s2648_s27, 1  ;;  %s2648_s27 = sphi %s2734_s27, %s24_s27   ;;  %s2644_s26 = sphi %s2732_s26, %s3034_s26   ;;  %s2640_s25 = sphi %s2730_s25, %s3033_s25  }
   0x3   : > { %p38_p1 = scmp.ge.s32.totalorder %s36_s28, 2  ;;  %p482_p2 = scmp.lt.s32.totalorder %s2648_s27, 3 }
   0x5   : > { %s3036_s28 = smov (%p38_p1, %s36_s28), 0  ;;  %p483_p3 = pnand %p2421_p0, %p482_p2 }
   0x6   : > { %p586_p4 = scmp.lt.s32.totalorder (!%p483_p3), %s2640_s25, 1  ;;  %v2650_v0 = vmov (!%p483_p3), 0.0   ;;  %s2651_s20 = smov (!%p483_p3), 127   ;;  %vm723_vm0 = vcmask (!%p483_p3), 64512   ;;  %v2438_v4 = vld [vmem:[%s3024_s5 + $0x10] sm:$0xff] (!%p483_p3)  ;;  %v2439_v5 = vld [vmem:[%s3024_s5 + $0x18] sm:$0xff] (!%p483_p3)  ;;  %v667_v15 = vlaneseq (!%p483_p3) }
   0x7   : > { %486 = sbr.rel (%p483_p3) target bundleno = 886 (0x376), region = 64  ;;  %985 = vmatprep.mubr.f32.mxu0 (!%p483_p3), %v2650_v0  ;;  %794 = vmatprep.mubr.f32.mxu1 (!%p483_p3), %v2650_v0  ;;  %s2652_s21 = smov (!%p483_p3), 113   ;;  %v2659_v8 = vmov (!%p483_p3), 0   ;;  %v1617_v9 = vld [vmem:[%s3025_s6 + $0x8] sm:$0xff] (!%p483_p3)  ;;  %v1616_v10 = vld [vmem:[%s3025_s6] sm:$0xff] (!%p483_p3)  ;;  %vm908_vm2 = vcmask (!%p483_p3), 1039360  }
   0x8   : > { %s2653_s22 = smov (!%p483_p3), 112   ;;  %s2654_s23 = smov (!%p483_p3), 111   ;;  %2601 = vset.pattern.permute.xlu1 (!%p483_p3), %v2659_v8  ;;  %2600 = vset.pattern.permute.xlu0 (!%p483_p3), %v2659_v8  ;;  %v2057_v13 = vld [vmem:[%s3029_s10] sm:$0xff] (!%p483_p3)  ;;  %v2058_v14 = vld [vmem:[%s3029_s10 + $0x8] sm:$0xff] (!%p483_p3)  ;;  %v668_v16 = vand.u32 (!%p483_p3), 127, %v667_v15  ;;  %vm1011_vm4 = vcmask (!%p483_p3), 924672  }
   0x9   : > { %s2655_s30 = smov (!%p483_p3), 97   ;;  %s2657_s17 = smov (!%p483_p3), 1   ;;  %v2446_v29 = vld [vmem:[%s3024_s5 + $0x20] sm:$0xff] (!%p483_p3)  ;;  %v2447_v35 = vld [vmem:[%s3024_s5 + $0x28] sm:$0xff] (!%p483_p3)  ;;  %vm1114_vm7 = vcmask (!%p483_p3), 916480   ;;  %v2452_v38 = vld [vmem:[%s3024_s5 + $0x30] sm:$0xff] (!%p483_p3) }
   0xa   : > { %v669_v17 = vadd.s32 (!%p483_p3), 128, %v668_v16  ;;  %v674_v19 = vand.u32 (!%p483_p3), 15, %v668_v16  ;;  %v2453_v43 = vld [vmem:[%s3024_s5 + $0x38] sm:$0xff] (!%p483_p3)  ;;  %vm1215_vm8 = vcmask (!%p483_p3), 908288   ;;  %v2458_v47 = vld [vmem:[%s3024_s5 + $0x40] sm:$0xff] (!%p483_p3)  ;;  %vm1318_vm9 = vcmask (!%p483_p3), 793600  }
   0xb   : > { %v2459_v51 = vld [vmem:[%s3024_s5 + $0x48] sm:$0xff] (!%p483_p3)  ;;  %v2462_v55 = vld [vmem:[%s3024_s5 + $0x50] sm:$0xff] (!%p483_p3)  ;;  %vm1421_vm10 = vcmask (!%p483_p3), 785408   ;;  %v2463_v59 = vld [vmem:[%s3024_s5 + $0x58] sm:$0xff] (!%p483_p3)  ;;  %vm713_vm11 = vcmask (!%p483_p3), 7168   ;;  %vm1522_vm12 = vcmask (!%p483_p3), 777216  }
   0xc   : > { %v681_v18 = vand.u32 (!%p483_p3), 15, %v669_v17  ;;  %v2810_v23 = vadd.s32 (!%p483_p3), 1, %v674_v19  ;;  %v2816_v27 = vadd.s32 (!%p483_p3), 4294967295, %v674_v19  ;;  %v2468_v63 = vld [vmem:[%s3024_s5 + $0x60] sm:$0xff] (!%p483_p3)  ;;  %v695_v15 = vld [vmem:[%s3024_s5 + $0x8] sm:$0xff] (!%p483_p3)  ;;  %vm1919_vm13 = vcmask (!%p483_p3), 130048  }
   0xe   : > { %s3038_s25 = smov (!%p586_p4, %s2640_s25), 1  ;;  %v2808_v20 = vadd.s32 1, %v681_v18  ;;  %v2813_v24 = vadd.s32 4294967295, %v681_v18  ;;  %vm897_vm3 = vcmp.lt.s32.totalorder %v2810_v23, 16  ;;  %vm698_vm6 = vcmp.ge.s32.totalorder %v2816_v27, 0  ;;  %v2475_v18 = vld [vmem:[%s3024_s5 + $0x78] sm:$0xff] }
   0xf   : > { %s2508_s29 = sshll.u32 %s3038_s25, 5  ;;  %s2773_s18 = sshll.u32 %s3038_s25, 4  ;;  %v2485_v27 = vld [vmem:[%s3027_s8 + $0x18] sm:$0xff]  ;;  %v2493_v23 = vld [vmem:[%s3027_s8 + $0x28] sm:$0xff] }
  0x10   : > { %s593_s15 = scalar_lea.vmem %s3019_s0, %s2508_s29  ;;  %s2510_s16 = sadd.s32 16, %s2508_s29  ;;  %vm898_vm1 = vcmp.lt.s32.totalorder %v2808_v20, 16  ;;  %vm699_vm5 = vcmp.ge.s32.totalorder %v2813_v24, 0  ;;  %v2479_v24 = vld [vmem:[%s3024_s5 + $0x88] sm:$0xff] }
  0x11   : > { %v663_v1 = vld [vmem:[%s593_s15 + $0x8] sm:$0xff]  ;;  %v662_v2 = vld [vmem:[%s593_s15] sm:$0xff]  ;;  %s604_s19 = scalar_lea.vmem %s3020_s1, %s2510_s16  ;;  %s2656_s16 = smov 96  }
  0x12   : > { %904 = vrot.lane.b32.xlu0 %v663_v1, %s2651_s20  ;;  %902 = vrot.lane.b32.xlu1 %v662_v2, %s2651_s20  ;;  %v664_v3 = vld [vmem:[%s604_s19] sm:$0xff]  ;;  %s2658_s19 = smov 95   ;;  %v1633_v20 = vld [vmem:[%s3027_s8 + $0x8] sm:$0xff] }
  0x13   : > { %730 = vmatprep.subr.mxu1 %v663_v1 }
  0x14   : > { %731 = vmatpush1.msra.mxu1 %v662_v2 }
  0x15   : > { %2440 = vmatmul.mubr.msk.f32.vlgmr.msra.gmra.mrb[0].mxu1 %vm723_vm0, %v2438_v4 }
  0x16   : > { %906 = vrot.lane.b32.xlu0 %v664_v3, %s2651_s20  ;;  %1007 = vrot.lane.b32.xlu1 %v663_v1, %s2652_s21 }
  0x17   : > { %800 = vmatprep.mubr.f32.mxu1 %v2650_v0 }
  0x19   : > { %2441 = vmatmul.mubr.msk.f32.gmra.mrb[2].mxu1 %vm723_vm0, %v2439_v5  ;;  %v2469_v5 = vld [vmem:[%s3024_s5 + $0x68] sm:$0xff] }
  0x1a   : > { %1009 = vrot.lane.b32.xlu0 %v664_v3, %s2652_s21  ;;  %1005 = vrot.lane.b32.xlu1 %v662_v2, %s2652_s21  ;;  %s640_s21 = scalar_lea.vmem %s3030_s11, %s2773_s18 }
  0x1b   : > { %877 = vmatprep.mubr.f32.mxu1 %v2650_v0 }
  0x1e   : > { %1110 = vrot.lane.b32.xlu0 %v663_v1, %s2653_s22  ;;  %1112 = vrot.lane.b32.xlu1 %v664_v3, %s2653_s22 }
  0x22   : > { %1108 = vrot.lane.b32.xlu0 %v662_v2, %s2653_s22  ;;  %1211 = vrot.lane.b32.xlu1 %v663_v1, %s2654_s23 }
  0x26   : > { %1213 = vrot.lane.b32.xlu0 %v664_v3, %s2654_s23  ;;  %1209 = vrot.lane.b32.xlu1 %v662_v2, %s2654_s23  ;;  %s615_s23 = scalar_lea.vmem %s3021_s2, %s2773_s18 }
  0x27   : > { %v2780_v6 = vld [vmem:[%s615_s23] sm:$0xff]  ;;  %v2782_v7 = vld [vmem:[%s615_s23 + $0x8] sm:$0xff] }
  0x2a   : > { %1314 = vrot.lane.b32.xlu0 %v663_v1, %s2655_s30  ;;  %1316 = vrot.lane.b32.xlu1 %v664_v3, %s2655_s30 }
  0x2e   : > { %1312 = vrot.lane.b32.xlu0 %v662_v2, %s2655_s30  ;;  %1417 = vrot.lane.b32.xlu1 %v663_v1, %s2656_s16  ;;  %s625_s30 = scalar_lea.vmem %s3022_s3, %s2773_s18 }
  0x32   : > { %1419 = vrot.lane.b32.xlu0 %v664_v3, %s2656_s16  ;;  %1415 = vrot.lane.b32.xlu1 %v662_v2, %s2656_s16  ;;  %s631_s16 = scalar_lea.vmem %s3023_s4, %s2773_s18 }
  0x33   : > { %v2008_v11 = vld [vmem:[%s631_s16 + $0x8] sm:$0xff]  ;;  %v2007_v12 = vld [vmem:[%s631_s16] sm:$0xff]  ;;  %s660_s16 = scalar_lea.vmem %s3032_s13, %s2773_s18 }
  0x36   : > { %709 = vrot.lane.b32.xlu0 %v662_v2, %s2657_s17  ;;  %711 = vrot.lane.b32.xlu1 %v663_v1, %s2657_s17 }
  0x3a   : > { %1518 = vrot.lane.b32.xlu0 %v663_v1, %s2658_s19  ;;  %1520 = vrot.lane.b32.xlu1 %v664_v3, %s2658_s19 }
  0x3e   : > { %707 = vrot.lane.b32.xlu0 %v2650_v0, %s2657_s17  ;;  %1516 = vrot.lane.b32.xlu1 %v662_v2, %s2658_s19 }
  0x42   : > { %1636 = vrot.lane.b32.xlu0 %v2780_v6, %s2657_s17  ;;  %1638 = vrot.lane.b32.xlu1 %v2782_v7, %s2657_s17 }
  0x46   : > { %1625 = vperm.xlu1 %2601, %v1617_v9   ;;  %1620 = vperm.xlu0 %2600, %v1616_v10   ;;  %v694_v10 = vld [vmem:[%s3024_s5] sm:$0xff] }
  0x4a   : > { %1820 = vrot.lane.b32.xlu1 %v2782_v7, %s2651_s20  ;;  %1822 = vrot.lane.b32.xlu0 %v2650_v0, %s2651_s20 }
  0x4e   : > { %1818 = vrot.lane.b32.xlu1 %v2780_v6, %s2651_s20  ;;  %2016 = vperm.xlu0 %2600, %v2008_v11  }
  0x52   : > { %2011 = vperm.xlu1 %2601, %v2007_v12   ;;  %2061 = vperm.xlu0 %2600, %v2057_v13   ;;  %v2474_v13 = vld [vmem:[%s3024_s5 + $0x70] sm:$0xff] }
  0x56   : > { %2066 = vperm.xlu1 %2601, %v2058_v14  }
  0x84   : > { %v905_v21 = vpop.permute.xlu0 %904  ;;  %v903_v22 = vpop.permute.xlu1 %902 }
  0x85   : > { %v909_v30 = vsel %vm908_vm2, %v903_v22, %v905_v21 }
  0x88   : > { %v907_v25 = vpop.permute.xlu0 %906  ;;  %v1008_v26 = vpop.permute.xlu1 %1007 }
  0x89   : > { %v910_v28 = vsel %vm908_vm2, %v905_v21, %v907_v25  ;;  %v2484_v21 = vld [vmem:[%s3027_s8 + $0x10] sm:$0xff]  ;;  %v2478_v25 = vld [vmem:[%s3024_s5 + $0x80] sm:$0xff] }
  0x8a   : > { %2448 = vmatprep.subr.msk.mxu0 %vm898_vm1, %v910_v28 }
  0x8b   : > { %2449 = vmatpush1.msk.msra.mxu0 %vm897_vm3, %v909_v30 }
  0x8c   : > { %v1010_v31 = vpop.permute.xlu0 %1009  ;;  %2450 = vmatmul.mubr.msk.f32.vlgmr.msra.gmra.mrb[0].mxu0 %vm723_vm0, %v2446_v29  ;;  %v1006_v32 = vpop.permute.xlu1 %1005 }
  0x8d   : > { %v1013_v33 = vsel %vm1011_vm4, %v1008_v26, %v1010_v31  ;;  %v1012_v34 = vsel %vm1011_vm4, %v1006_v32, %v1008_v26  ;;  %991 = vmatprep.mubr.f32.mxu0 %v2650_v0 }
  0x8e   : > { %2454 = vmatprep.subr.msk.mxu0 %vm699_vm5, %v1013_v33 }
  0x8f   : > { %2455 = vmatpush1.msk.msra.mxu0 %vm698_vm6, %v1012_v34  ;;  %v1632_v34 = vld [vmem:[%s3027_s8] sm:$0xff] }
  0x90   : > { %v1111_v36 = vpop.permute.xlu0 %1110  ;;  %2451 = vmatmul.mubr.msk.f32.gmra.mrb[2].mxu0 %vm723_vm0, %v2447_v35  ;;  %v1113_v37 = vpop.permute.xlu1 %1112  ;;  %v2492_v35 = vld [vmem:[%s3027_s8 + $0x20] sm:$0xff] }
  0x91   : > { %1088 = vmatprep.mubr.f32.mxu0 %v2650_v0  ;;  %v1116_v39 = vsel %vm1114_vm7, %v1111_v36, %v1113_v37 }
  0x92   : > { %1125 = vmatprep.subr.mxu0 %v1116_v39 }
  0x94   : > { %v1109_v40 = vpop.permute.xlu0 %1108  ;;  %2456 = vmatmul.mubr.msk.f32.vlgmr.msra.gmra.mrb[0].mxu0 %vm723_vm0, %v2452_v38  ;;  %v1212_v41 = vpop.permute.xlu1 %1211 }
  0x95   : > { %v1115_v42 = vsel %vm1114_vm7, %v1109_v40, %v1111_v36  ;;  %1094 = vmatprep.mubr.f32.mxu0 %v2650_v0 }
  0x96   : > { %1126 = vmatpush1.msra.mxu0 %v1115_v42 }
  0x98   : > { %v1214_v44 = vpop.permute.xlu0 %1213  ;;  %2457 = vmatmul.mubr.msk.f32.gmra.mrb[2].mxu0 %vm723_vm0, %v2453_v43  ;;  %v1210_v45 = vpop.permute.xlu1 %1209 }
  0x99   : > { %v1217_v46 = vsel %vm1215_vm8, %v1212_v41, %v1214_v44  ;;  %1189 = vmatprep.mubr.f32.mxu0 %v2650_v0  ;;  %v1216_v48 = vsel %vm1215_vm8, %v1210_v45, %v1212_v41 }
  0x9a   : > { %2464 = vmatprep.subr.msk.mxu0 %vm898_vm1, %v1217_v46 }
  0x9c   : > { %v1315_v49 = vpop.permute.xlu0 %1314  ;;  %2460 = vmatmul.mubr.msk.f32.vlgmr.msra.gmra.mrb[0].mxu0 %vm723_vm0, %v2458_v47  ;;  %v1317_v50 = vpop.permute.xlu1 %1316 }
  0x9d   : > { %1195 = vmatprep.mubr.f32.mxu0 %v2650_v0  ;;  %2465 = vmatpush1.msk.msra.mxu0 %vm897_vm3, %v1216_v48  ;;  %v1320_v52 = vsel %vm1318_vm9, %v1315_v49, %v1317_v50 }
  0x9e   : > { %2470 = vmatprep.subr.msk.mxu0 %vm699_vm5, %v1320_v52 }
  0xa0   : > { %v1313_v53 = vpop.permute.xlu0 %1312  ;;  %2461 = vmatmul.mubr.msk.f32.gmra.mrb[2].mxu0 %vm723_vm0, %v2459_v51  ;;  %v1418_v54 = vpop.permute.xlu1 %1417 }
  0xa1   : > { %1292 = vmatprep.mubr.f32.mxu0 %v2650_v0  ;;  %v1319_v56 = vsel %vm1318_vm9, %v1313_v53, %v1315_v49 }
  0xa4   : > { %v1420_v57 = vpop.permute.xlu0 %1419  ;;  %2466 = vmatmul.mubr.msk.f32.vlgmr.msra.gmra.mrb[0].mxu0 %vm723_vm0, %v2462_v55  ;;  %v1416_v58 = vpop.permute.xlu1 %1415 }
  0xa5   : > { %1298 = vmatprep.mubr.f32.mxu0 %v2650_v0  ;;  %2471 = vmatpush1.msk.msra.mxu0 %vm698_vm6, %v1319_v56  ;;  %v1423_v60 = vsel %vm1421_vm10, %v1418_v54, %v1420_v57  ;;  %v1422_v2 = vsel %vm1421_vm10, %v1416_v58, %v1418_v54  ;;  %v1917_v56 = vld [vmem:[%s3026_s7] sm:$0xff]  ;;  %v1918_v57 = vld [vmem:[%s3026_s7 + $0x8] sm:$0xff] }
  0xa6   : > { %1432 = vmatprep.subr.mxu0 %v1423_v60 }
  0xa8   : > { %v710_v61 = vpop.permute.xlu0 %709  ;;  %2467 = vmatmul.mubr.msk.f32.gmra.mrb[2].mxu0 %vm723_vm0, %v2463_v59  ;;  %v712_v62 = vpop.permute.xlu1 %711 }
  0xa9   : > { %1395 = vmatprep.mubr.f32.mxu0 %v2650_v0  ;;  %v715_v1 = vsel %vm713_vm11, %v710_v61, %v712_v62 }
  0xaa   : > { %2442 = vmatprep.subr.msk.mxu1 %vm699_vm5, %v715_v1 }
  0xac   : > { %v1519_v3 = vpop.permute.xlu0 %1518  ;;  %2472 = vmatmul.mubr.msk.f32.vlgmr.msra.gmra.mrb[0].mxu0 %vm723_vm0, %v2468_v63  ;;  %v1521_v4 = vpop.permute.xlu1 %1520 }
  0xad   : > { %1433 = vmatpush1.msra.mxu0 %v1422_v2  ;;  %1401 = vmatprep.mubr.f32.mxu0 %v2650_v0  ;;  %v1524_v8 = vsel %vm1522_vm12, %v1519_v3, %v1521_v4 }
  0xae   : > { %2480 = vmatprep.subr.msk.mxu0 %vm898_vm1, %v1524_v8 }
  0xb0   : > { %v708_v9 = vpop.permute.xlu0 %707  ;;  %2473 = vmatmul.mubr.msk.f32.gmra.mrb[2].mxu0 %vm723_vm0, %v2469_v5  ;;  %v1517_v11 = vpop.permute.xlu1 %1516 }
  0xb1   : > { %v714_v12 = vsel %vm713_vm11, %v708_v9, %v710_v61  ;;  %1496 = vmatprep.mubr.f32.mxu0 %v2650_v0  ;;  %v1523_v14 = vsel %vm1522_vm12, %v1517_v11, %v1519_v3 }
  0xb2   : > { %2443 = vmatpush1.msk.msra.mxu1 %vm698_vm6, %v714_v12 }
  0xb3   : > { %2444 = vmatmul.mubr.msk.f32.vlgmr.msra.gmra.mrb[0].mxu1 %vm723_vm0, %v694_v10  ;;  %1655 = vmatprep.subr.mxu1 %v2782_v7 }
  0xb4   : > { %2476 = vmatmul.mubr.msk.f32.vlgmr.msra.gmra.mrb[0].mxu0 %vm723_vm0, %v2474_v13  ;;  %883 = vmatprep.mubr.f32.mxu1 %v2650_v0  ;;  %v1637_v16 = vpop.permute.xlu0 %1636  ;;  %v1639_v17 = vpop.permute.xlu1 %1638 }
  0xb5   : > { %1502 = vmatprep.mubr.f32.mxu0 %v2650_v0  ;;  %2481 = vmatpush1.msk.msra.mxu0 %vm897_vm3, %v1523_v14  ;;  %v1641_v19 = vsel %vm713_vm11, %v1637_v16, %v1639_v17  ;;  %v1640_v22 = vsel %vm713_vm11, %v708_v9, %v1637_v16 }
  0xb6   : > { %1656 = vmatpush1.msra.mxu1 %v2780_v6 }
  0xb7   : > { %2445 = vmatmul.mubr.msk.f32.gmra.mrb[2].mxu1 %vm723_vm0, %v695_v15  ;;  %2488 = vmatprep.subr.msk.mxu1 %vm699_vm5, %v1641_v19 }
  0xb8   : > { %2477 = vmatmul.mubr.msk.f32.gmra.mrb[2].mxu0 %vm723_vm0, %v2475_v18  ;;  %1719 = vmatprep.mubr.f32.mxu1 %v2650_v0 }
  0xb9   : > { %1599 = vmatprep.mubr.f32.mxu0 %v2650_v0 }
  0xbb   : > { %2486 = vmatmul.mubr.msk.f32.vlgmr.msra.gmra.mrb[4].mxu1 %vm723_vm0, %v2484_v21 }
  0xbc   : > { %2489 = vmatpush1.msk.msra.mxu1 %vm698_vm6, %v1640_v22  ;;  %2482 = vmatmul.mubr.msk.f32.vlgmr.msra.gmra.mrb[0].mxu0 %vm723_vm0, %v2478_v25 }
  0xbd   : > { %1605 = vmatprep.mubr.f32.mxu0 %v2650_v0  ;;  %1725 = vmatprep.mubr.f32.mxu1 %v2650_v0 }
  0xbf   : > { %2487 = vmatmul.mubr.msk.f32.gmra.mrb[6].mxu1 %vm723_vm0, %v2485_v27  ;;  %v2055_v27 = vld [vmem:[%s3028_s9] sm:$0xff] }
  0xc0   : > { %2483 = vmatmul.mubr.msk.f32.gmra.mrb[2].mxu0 %vm723_vm0, %v2479_v24  ;;  %1802 = vmatprep.mubr.f32.mxu1 %v2650_v0 }
  0xc3   : > { %2490 = vmatmul.mubr.msk.f32.vlgmr.msra.gmra.mrb[4].mxu1 %vm723_vm0, %v1632_v34 }
  0xc4   : > { %1808 = vmatprep.mubr.f32.mxu1 %v2650_v0 }
  0xc5   : > { %v1626_v26 = vpop.permute.xlu1 %1625  ;;  %v1621_v28 = vpop.permute.xlu0 %1620 }
  0xc7   : > { %2491 = vmatmul.mubr.msk.f32.gmra.mrb[6].mxu1 %vm723_vm0, %v1633_v20  ;;  %v2158_v20 = vld [vmem:[%s625_s30] sm:$0xff] }
  0xc8   : > { %1900 = vmatprep.mubr.f32.mxu1 %v2650_v0 }
  0xc9   : > { %v1821_v29 = vpop.permute.xlu1 %1820  ;;  %v1823_v30 = vpop.permute.xlu0 %1822 }
  0xca   : > { %v1825_v31 = vsel %vm908_vm2, %v1821_v29, %v1823_v30 }
  0xcb   : > { %2494 = vmatprep.subr.msk.mxu1 %vm898_vm1, %v1825_v31 }
  0xcd   : > { %v1819_v32 = vpop.permute.xlu1 %1818  ;;  %v2017_v9 = vpop.permute.xlu0 %2016 }
  0xce   : > { %v1824_v33 = vsel %vm908_vm2, %v1819_v32, %v1821_v29  ;;  %v2056_v32 = vld [vmem:[%s3028_s9 + $0x8] sm:$0xff] }
  0xcf   : > { %2495 = vmatpush1.msk.msra.mxu1 %vm897_vm3, %v1824_v33 }
  0xd0   : > { %2496 = vmatmul.mubr.msk.f32.vlgmr.msra.gmra.mrb[4].mxu1 %vm723_vm0, %v2492_v35 }
  0xd1   : > { %1906 = vmatprep.mubr.f32.mxu1 %v2650_v0  ;;  %v2012_v16 = vpop.permute.xlu1 %2011  ;;  %v2062_v33 = vpop.permute.xlu0 %2061 }
  0xd4   : > { %2497 = vmatmul.mubr.msk.f32.gmra.mrb[6].mxu1 %vm723_vm0, %v2493_v23 }
  0xd5   : > { %1990 = vmatprep.mubr.f32.mxu1 %v2650_v0 }
 0x186   : > { %v879_v36 = vpop.f32.mrb[0].mxu1 }
 0x187   : > { %v881_v37 = vpop.f32.mrb[1].mxu1 }
 0x18a   : > { %v885_v38 = vpop.f32.mrb[2].mxu1 }
 0x18b   : > { %v887_v39 = vpop.f32.mrb[3].mxu1 }
 0x18f   : > { %v1601_v40 = vpop.f32.mrb[0].mxu0 }
 0x190   : > { %v2522_v41 = vadd.f32 %v1601_v40, %v879_v36  ;;  %v1603_v42 = vpop.f32.mrb[1].mxu0  ;;  %v2159_v36 = vld [vmem:[%s625_s30 + $0x8] sm:$0xff] }
 0x191   : > { %v2523_v43 = vadd.f32 %v1603_v42, %v881_v37 }
 0x192   : > { %v1628_v48 = vadd.f32 %v2522_v41, %v1621_v28 }
 0x193   : > { %v1607_v44 = vpop.f32.mrb[2].mxu0  ;;  %v1629_v50 = vadd.f32 %v2523_v43, %v1621_v28 }
 0x194   : > { %v2524_v45 = vadd.f32 %v1607_v44, %v885_v38  ;;  %v1609_v46 = vpop.f32.mrb[3].mxu0  ;;  %v2067_v38 = vpop.permute.xlu1 %2066 }
 0x195   : > { %v2525_v47 = vadd.f32 %v1609_v46, %v887_v39 }
 0x196   : > { %v1630_v49 = vadd.f32 %v2524_v45, %v1626_v26 }
 0x197   : > { %v1631_v51 = vadd.f32 %v2525_v47, %v1626_v26 }
 0x198   : > { %v2520_v52 = vpack.c.bf16 %v1630_v49, %v1628_v48  ;;  %v2502_v53 = vmul.f32 -1.442695, %v1630_v49 }
 0x199   : > { %v2503_v54 = vmul.f32 -1.442695, %v1631_v51  ;;  %v2518_v55 = vpack.c.bf16 %v1631_v51, %v1629_v50 }
 0x19a   : > { %2602 = vpow2.f32 %v2502_v53 }
 0x19b   : > { %2604 = vpow2.f32 %v2503_v54  ;;  %2519 = vmatprep.subr.bf16.mxu1 %v2518_v55 }
 0x19c   : > { %2521 = vmatpush1.bf16.msra.mxu1 %v2520_v52  ;;  %2606 = vtanh.f32 %v1628_v48 }
 0x19d   : > { %2608 = vtanh.f32 %v1629_v50 }
 0x19f   : > { %2498 = vmatmul.mubr.msk.f32.vlgmr.msra.gmra.mrb[4].mxu1 %vm1919_vm13, %v1917_v56 }
 0x1a0   : > { %1996 = vmatprep.mubr.f32.mxu1 %v2650_v0 }
 0x1a3   : > { %2499 = vmatmul.mubr.msk.f32.gmra.mrb[6].mxu1 %vm1919_vm13, %v1918_v57 }
 0x1a4   : > { %v2603_v58 = vpop.eup %2602  ;;  %2139 = vmatprep.mubr.f32.mxu1 %v2650_v0 }
 0x1a5   : > { %v2605_v59 = vpop.eup %2604  ;;  %v2047_v60 = vadd.f32 1.0, %v2603_v58 }
 0x1a6   : > { %v2048_v61 = vadd.f32 1.0, %v2605_v59  ;;  %v2607_v62 = vpop.eup %2606 }
 0x1a7   : > { %2610 = vrcp.f32 %v2047_v60  ;;  %v2609_v63 = vpop.eup %2608 }
 0x1a8   : > { %2612 = vrcp.f32 %v2048_v61 }
 0x1b1   : > { %v2611_v1 = vpop.eup %2610 }
 0x1b2   : > { %v2613_v2 = vpop.eup %2612  ;;  %v2053_v3 = vmul.f32 %v2611_v1, %v2607_v62 }
 0x1b3   : > { %v2054_v4 = vmul.f32 %v2613_v2, %v2609_v63 }
 0x1b4   : > { %2154 = vst [vmem:[%s640_s21] sm:$0xff] %v2053_v3 }
 0x1b5   : > { %2155 = vst [vmem:[%s640_s21 + $0x8] sm:$0xff] %v2054_v4  ;;  %s650_s21 = scalar_lea.vmem %s3031_s12, %s2773_s18 }
 0x272   : > { %v1992_v5 = vpop.f32.mrb[4].mxu1 }
 0x273   : > { %v1994_v8 = vpop.f32.mrb[5].mxu1  ;;  %v2019_v17 = vadd.f32 %v2012_v16, %v1992_v5 }
 0x274   : > { %v2020_v18 = vadd.f32 %v2012_v16, %v1994_v8 }
 0x276   : > { %v1998_v10 = vpop.f32.mrb[6].mxu1 }
 0x277   : > { %v2021_v11 = vadd.f32 %v2017_v9, %v1998_v10  ;;  %v2000_v12 = vpop.f32.mrb[7].mxu1 }
 0x278   : > { %v2022_v13 = vadd.f32 %v2017_v9, %v2000_v12 }
 0x279   : > { %v2500_v14 = vmul.f32 -1.442695, %v2021_v11 }
 0x27a   : > { %v2501_v15 = vmul.f32 -1.442695, %v2022_v13 }
 0x27b   : > { %2614 = vpow2.f32 %v2500_v14 }
 0x27c   : > { %2616 = vpow2.f32 %v2501_v15 }
 0x27d   : > { %2618 = vtanh.f32 %v2019_v17 }
 0x27e   : > { %2620 = vtanh.f32 %v2020_v18 }
 0x285   : > { %v2615_v19 = vpop.eup %2614 }
 0x286   : > { %v2617_v21 = vpop.eup %2616  ;;  %v2031_v22 = vadd.f32 1.0, %v2615_v19 }
 0x287   : > { %v2032_v25 = vadd.f32 1.0, %v2617_v21  ;;  %v2619_v24 = vpop.eup %2618 }
 0x288   : > { %2622 = vrcp.f32 %v2031_v22  ;;  %v2621_v26 = vpop.eup %2620 }
 0x289   : > { %2624 = vrcp.f32 %v2032_v25 }
 0x292   : > { %v2623_v28 = vpop.eup %2622 }
 0x293   : > { %v2625_v29 = vpop.eup %2624  ;;  %v2037_v30 = vmul.f32 %v2623_v28, %v2619_v24 }
 0x294   : > { %v2038_v31 = vmul.f32 %v2625_v29, %v2621_v26 }
 0x296   : > { %2075 = vmatprep.subr.mxu1 %v2038_v31 }
 0x297   : > { %2076 = vmatpush1.msra.mxu1 %v2037_v30 }
 0x298   : > { %2504 = vmatmul.mubr.msk.f32.vlgmr.msra.gmra.mrb[8].mxu1 %vm723_vm0, %v2055_v27 }
 0x299   : > { %2145 = vmatprep.mubr.f32.mxu1 %v2650_v0 }
 0x29c   : > { %2505 = vmatmul.mubr.msk.f32.gmra.mrb[10].mxu1 %vm723_vm0, %v2056_v32 }
 0x36b   : > { %v2141_v34 = vpop.f32.mrb[8].mxu1 }
 0x36c   : > { %v2142_v35 = vadd.f32 %v2141_v34, %v2062_v33  ;;  %v2143_v23 = vpop.f32.mrb[9].mxu1 }
 0x36d   : > { %v2144_v0 = vadd.f32 %v2143_v23, %v2062_v33 }
 0x36e   : > { %v2160_v37 = vadd.f32 %v2158_v20, %v2142_v35 }
 0x36f   : > { %v2161_v39 = vadd.f32 %v2159_v36, %v2144_v0  ;;  %v2147_v40 = vpop.f32.mrb[10].mxu1 }
 0x370   : > { %2162 = vst [vmem:[%s660_s16] sm:$0xff] %v2160_v37  ;;  %v2148_v41 = vadd.f32 %v2147_v40, %v2067_v38  ;;  %v2149_v42 = vpop.f32.mrb[11].mxu1 }
 0x371   : > { %2163 = vst [vmem:[%s660_s16 + $0x8] sm:$0xff] %v2161_v39  ;;  %v2150_v43 = vadd.f32 %v2149_v42, %v2067_v38 }
 0x372   : > { %v2152_v44 = vadd.f32 %v2148_v41, %v2780_v6 }
 0x373   : > { %v2153_v45 = vadd.f32 %v2150_v43, %v2782_v7 }
 0x374   : > { %2156 = vst [vmem:[%s650_s21] sm:$0xff] %v2152_v44 }
 0x375   : > { %2157 = vst [vmem:[%s650_s21 + $0x8] sm:$0xff] %v2153_v45 }
 0x376 PF: > { %s24_s27 = sadd.s32 1, %s2648_s27   ;;  %s3033_s25 = smov %s2644_s26 }
 0x377   : > { %p21_p5 = scmp.ge.s32.totalorder %s24_s27, 4   ;;  %s3034_s26 = smov %s3036_s28 }
 0x379   :  { %23 = sbr.rel (!%p21_p5) target bundleno = 2 (0x2), region = 140 }

</bundles_post_ra>
